<compile_context>
chip_gen: v5e
topology: v5e:2x2
jax: 0.10.0
libtpu: 0.0.40
codegen_flags: <defaults>
</compile_context>

<pallas_src>
import functools

import jax
import jax.numpy as jnp
from jax.experimental import pallas as pl
from jax.experimental.pallas import tpu as pltpu


# -----------------------------------------------------------------------------
# Kernels
# -----------------------------------------------------------------------------
def _conv_strip_kernel(xm_ref, xh_ref, w_ref, b_ref, o_ref, *stat_refs,
                       K, Kq, stride, TH, W_out, C_out, H_out,
                       fuse_relu, emit_stats):
    """One (batch, row-strip) grid step.

    xm_ref : (1, TH*stride, Wq, Cq)  main input rows (space-to-depth over W, bf16)
    xh_ref : (1, hq*stride, Wq, Cq)  halo rows just below the main block
    w_ref  : (K*Kq*Cq, C_out)        packed conv weights (resident, bf16)
    b_ref  : (1, C_out)              conv bias (f32)
    o_ref  : (1, TH, W_out, C_out)   conv output strip (f32, or bf16 when BN follows)
    stat_refs (only when emit_stats): sum_ref, sq_ref -> (1, 1, C_out) per-batch
                                      accumulators for the fused BatchNorm statistics.
    """
    x = jnp.concatenate([xm_ref[0], xh_ref[0]], axis=0)        # (rows, Wq, Cq)
    wq, cq = x.shape[1], x.shape[2]
    groups = x.shape[0] // stride
    xg = x.reshape(groups, stride, wq, cq)                     # split H into stride-groups

    # In-kernel im2col: every tap is a major/sublane slice, concatenated along the lane
    # dim so the whole strip is computed by a single MXU matmul.
    pieces = []
    for kh in range(K):
        rows = xg[kh // stride: kh // stride + TH, kh % stride]    # (TH, Wq, Cq)
        for dq in range(Kq):
            pieces.append(rows[:, dq:dq + W_out, :])               # (TH, W_out, Cq)
    lhs = pieces[0] if len(pieces) == 1 else jnp.concatenate(pieces, axis=-1)
    lhs2 = lhs.reshape(TH * W_out, K * Kq * cq)

    acc = jnp.dot(lhs2, w_ref[...], preferred_element_type=jnp.float32)
    acc = acc + b_ref[...]                                         # f32 bias add
    acc3 = acc.reshape(TH, W_out, C_out)

    if emit_stats:
        sum_ref, sq_ref = stat_refs
        j = pl.program_id(1)
        if H_out % TH != 0:
            # Mask rows that fall in the padded tail of H_out so BN stats are exact.
            rid = j * TH + jax.lax.broadcasted_iota(jnp.int32, (TH, 1, 1), 0)
            accm = jnp.where(rid < H_out, acc3, 0.0)
        else:
            accm = acc3

        @pl.when(j == 0)
        def _init():
            sum_ref[...] = jnp.zeros_like(sum_ref)
            sq_ref[...] = jnp.zeros_like(sq_ref)

        sum_ref[...] += jnp.sum(accm, axis=(0, 1), keepdims=True)
        sq_ref[...] += jnp.sum(accm * accm, axis=(0, 1), keepdims=True)

    if fuse_relu:
        acc3 = jnp.maximum(acc3, 0.0)
    # TODO(synk): a lane-dense store (merging W_out*C_out into the lane dim) would avoid
    # masked vst when C_out < 128, at the cost of an in-kernel relayout.
    o_ref[0] = acc3.astype(o_ref.dtype)


def _affine_act_kernel(x_ref, sc_ref, sh_ref, o_ref, *, apply_relu):
    """Fused BatchNorm apply: y = x * scale + shift (+ ReLU). Lane-dense blocks."""
    y = x_ref[...].astype(jnp.float32) * sc_ref[...] + sh_ref[...]
    if apply_relu:
        y = jnp.maximum(y, 0.0)
    o_ref[...] = y.astype(o_ref.dtype)


# -----------------------------------------------------------------------------
# Wrapper
# -----------------------------------------------------------------------------
def _smallest_divisor_at_least(n, m):
    m = max(1, min(m, n))
    for d in range(m, n + 1):
        if n % d == 0:
            return d
    return n


def _round_up(v, m):
    return ((v + m - 1) // m) * m


def base_conv(x_nchw, weight_oihw, bias, *, stride=1, activation=None, use_bn=False,
              bn_gamma=None, bn_beta=None, bn_eps=1e-5, compute_dtype=jnp.bfloat16):
    """Forward pass of BaseConv.  Input/output are NCHW (PyTorch convention)."""
    if activation not in (None, "relu"):
        # TODO(synk): only None / ReLU activations are supported (fused in-kernel).
        raise NotImplementedError("activation must be None or 'relu'")

    N, C_in, H, W = x_nchw.shape
    C_out, _, K, _ = weight_oihw.shape
    s = int(stride)
    p = K // 2

    H_out = (H + 2 * p - K) // s + 1
    W_out = (W + 2 * p - K) // s + 1
    Kq = -(-K // s)                      # taps along W in super-column units
    Cq = s * C_in                        # channels after space-to-depth over W
    KKC = K * Kq * Cq

    # ---- strip size (output rows per grid step), budgeted for VMEM -------------------
    Wq_tot = max(W_out + Kq - 1, -(-(p + W) // s))
    in_group_bytes = s * _round_up(Wq_tot, 16) * 128 * 2          # bf16, tile padded
    out_row_bytes = _round_up(W_out, 8) * 128 * 4                 # f32, tile padded
    budget = 8 * 1024 * 1024
    TH = max(1, min(H_out, budget // max(1, 2 * in_group_bytes + 2 * out_row_bytes)))
    if H_out >= 2:                                                # >=2 strips: pipelining + megacore
        TH = min(TH, (H_out + 1) // 2)
    TH = max(TH, max(Kq - 1, 1))
    num_strips = -(-H_out // TH)
    H_out_pad = num_strips * TH

    hq_blk = _smallest_divisor_at_least(TH, max(Kq - 1, 1))       # halo height (row-groups)
    BH = TH * s                                                   # main input block rows

    # ---- pad + space-to-depth over W (free reshape), cast to bf16 --------------------
    # TODO(synk): the zero padding could be fused into the kernel DMA (zero-filled halo)
    # to save one HBM pass over the activation.
    H_tot = (num_strips * TH + hq_blk) * s
    pad_bottom = H_tot - H - p
    pad_right = Wq_tot * s - W - p
    assert pad_bottom >= 0 and pad_right >= 0

    x = jnp.transpose(x_nchw, (0, 2, 3, 1)).astype(compute_dtype)        # NHWC
    x = jnp.pad(x, ((0, 0), (p, pad_bottom), (p, pad_right), (0, 0)))
    x = x.reshape(N, H_tot, Wq_tot, Cq)                                  # space-to-depth (free)

    # ---- pack weights: (C_out, C_in, K, K) -> (K*Kq*Cq, C_out) ------------------------
    w = jnp.transpose(weight_oihw, (2, 3, 1, 0))                         # (K, K, C_in, C_out)
    w = jnp.pad(w, ((0, 0), (0, Kq * s - K), (0, 0), (0, 0)))
    w_mat = w.reshape(K, Kq, s, C_in, C_out).reshape(KKC, C_out).astype(compute_dtype)
    b2 = jnp.asarray(bias, jnp.float32).reshape(1, C_out)

    fuse_relu = (activation == "relu") and (not use_bn)
    # When BN follows, the conv intermediate is write-once/read-once -> store in bf16 to
    # halve its HBM traffic (final result is produced in f32 by the BN-apply pass).
    inter_dtype = jnp.bfloat16 if use_bn else jnp.float32

    kernel = functools.partial(
        _conv_strip_kernel, K=K, Kq=Kq, stride=s, TH=TH, W_out=W_out, C_out=C_out,
        H_out=H_out, fuse_relu=fuse_relu, emit_stats=use_bn)

    in_specs = [
        pl.BlockSpec((1, BH, Wq_tot, Cq), lambda n, j: (n, j, 0, 0)),
        pl.BlockSpec((1, hq_blk * s, Wq_tot, Cq),
                     lambda n, j: (n, (j + 1) * (TH // hq_blk), 0, 0)),
        pl.BlockSpec((KKC, C_out), lambda n, j: (0, 0)),
        pl.BlockSpec((1, C_out), lambda n, j: (0, 0)),
    ]
    conv_spec = pl.BlockSpec((1, TH, W_out, C_out), lambda n, j: (n, j, 0, 0))
    conv_shape = jax.ShapeDtypeStruct((N, H_out_pad, W_out, C_out), inter_dtype)

    # Explicit VMEM budget so the same kernel is portable to v7x's 64 MiB VMEM.
    est = (2 * (BH + hq_blk * s) * _round_up(Wq_tot, 16) * 128 * 2
           + 2 * TH * _round_up(W_out, 8) * 128 * 4
           + _round_up(KKC, 16) * _round_up(C_out, 128) * 2
           + 4 * TH * _round_up(W_out, 8) * _round_up(KKC, 128) * 2
           + (1 << 20))
    vmem_limit = int(min(64 * 2 ** 20, max(16 * 2 ** 20, 2 * est)))

    cost = pl.CostEstimate(
        flops=2 * N * H_out * W_out * K * K * C_in * C_out,
        transcendentals=0,
        bytes_accessed=int(x.size * x.dtype.itemsize + w_mat.size * 2
                           + N * H_out * W_out * C_out * 4))

    if use_bn:
        stat_shape = jax.ShapeDtypeStruct((N, 1, C_out), jnp.float32)
        stat_spec = pl.BlockSpec((1, 1, C_out), lambda n, j: (n, 0, 0))
        out_shape = (conv_shape, stat_shape, stat_shape)
        out_specs = (conv_spec, stat_spec, stat_spec)
        semantics = ("parallel", "arbitrary")   # stats block is revisited along strips
    else:
        out_shape = conv_shape
        out_specs = conv_spec
        semantics = ("parallel", "parallel")

    result = pl.pallas_call(
        kernel,
        out_shape=out_shape,
        grid=(N, num_strips),
        in_specs=in_specs,
        out_specs=out_specs,
        compiler_params=pltpu.CompilerParams(
            dimension_semantics=semantics, vmem_limit_bytes=vmem_limit),
        cost_estimate=cost,
    )(x, x, w_mat, b2)     # x is passed twice: main block + halo block

    if use_bn:
        conv_out, psum, psq = result
        cnt = float(N * H_out * W_out)
        tot = jnp.sum(psum, axis=(0, 1))
        tot_sq = jnp.sum(psq, axis=(0, 1))
        mean = tot / cnt
        var = jnp.maximum(tot_sq / cnt - mean * mean, 0.0)
        gamma = (jnp.ones((C_out,), jnp.float32) if bn_gamma is None
                 else jnp.asarray(bn_gamma, jnp.float32))
        beta = (jnp.zeros((C_out,), jnp.float32) if bn_beta is None
                else jnp.asarray(bn_beta, jnp.float32))
        scale = gamma * jax.lax.rsqrt(var + bn_eps)
        shift = beta - mean * scale

        # Small second Pallas pass: normalize + affine + activation in one sweep.
        # Lane-dense layout: rows = N*H_out_pad, lanes = W_out*C_out (>= C_out, so the
        # lane masking of the old (rows, C_out) layout disappears / shrinks).
        L = W_out * C_out
        M2 = N * H_out_pad
        budget2 = 6 * 1024 * 1024
        cap = max(8, (budget2 // max(1, 12 * L)) // 8 * 8)
        TM2 = M2 if M2 <= cap else cap
        y2d = conv_out.reshape(M2, L)
        scale_t = jnp.tile(scale, W_out).reshape(1, L)     # index w*C_out + c -> scale[c]
        shift_t = jnp.tile(shift, W_out).reshape(1, L)
        out2d = pl.pallas_call(
            functools.partial(_affine_act_kernel, apply_relu=(activation == "relu")),
            out_shape=jax.ShapeDtypeStruct((M2, L), jnp.float32),
            grid=(pl.cdiv(M2, TM2),),
            in_specs=[pl.BlockSpec((TM2, L), lambda i: (i, 0)),
                      pl.BlockSpec((1, L), lambda i: (0, 0)),
                      pl.BlockSpec((1, L), lambda i: (0, 0))],
            out_specs=pl.BlockSpec((TM2, L), lambda i: (i, 0)),
            compiler_params=pltpu.CompilerParams(
                dimension_semantics=("parallel",),
                vmem_limit_bytes=32 * 2 ** 20),
        )(y2d, scale_t, shift_t)
        out_nhwc = out2d.reshape(N, H_out_pad, W_out, C_out)
    else:
        out_nhwc = result

    out_nhwc = out_nhwc[:, :H_out]
    return jnp.transpose(out_nhwc, (0, 3, 1, 2))


# -----------------------------------------------------------------------------
# Reference + test
# -----------------------------------------------------------------------------
def _reference(x_nchw, weight_oihw, bias, *, stride=1, activation=None,
               use_bn=False, bn_eps=1e-5):
    K = weight_oihw.shape[2]
    p = K // 2
    out = jax.lax.conv_general_dilated(
        x_nchw, weight_oihw, window_strides=(stride, stride),
        padding=((p, p), (p, p)), dimension_numbers=("NCHW", "OIHW", "NCHW"))
    out = out + bias[None, :, None, None]
    if use_bn:
        mean = jnp.mean(out, axis=(0, 2, 3), keepdims=True)
        var = jnp.mean((out - mean) ** 2, axis=(0, 2, 3), keepdims=True)
        out = (out - mean) * jax.lax.rsqrt(var + bn_eps)
    if activation == "relu":
        out = jax.nn.relu(out)
    return out


if __name__ == "__main__":
    key = jax.random.PRNGKey(0)
    k_x, k_w = jax.random.split(key)

    # BaseConv(in_channels=4, out_channels=8, kernel=3, ...)
    N, C_in, H, W = 2, 4, 16, 16
    C_out, K = 8, 3

    x = jax.random.normal(k_x, (N, C_in, H, W), dtype=jnp.float32)
    weight = 0.01 * jax.random.normal(k_w, (C_out, C_in, K, K), dtype=jnp.float32)
    bias = jnp.zeros((C_out,), dtype=jnp.float32)

    # Case 1: stride=1, ReLU, no BN.
    out1 = jax.block_until_ready(
        base_conv(x, weight, bias, stride=1, activation="relu", use_bn=False))
    ref1 = _reference(x, weight, bias, stride=1, activation="relu", use_bn=False)
    assert out1.shape == ref1.shape, (out1.shape, ref1.shape)
    assert jnp.allclose(out1, ref1, atol=5e-3, rtol=5e-2), \
        float(jnp.max(jnp.abs(out1 - ref1)))

    # Case 2: stride=2, BatchNorm + ReLU (exercises in-kernel stride + fused BN stats).
    out2 = jax.block_until_ready(
        base_conv(x, weight, bias, stride=2, activation="relu", use_bn=True))
    ref2 = _reference(x, weight, bias, stride=2, activation="relu", use_bn=True)
    assert out2.shape == ref2.shape, (out2.shape, ref2.shape)
    assert jnp.allclose(out2, ref2, atol=3e-2, rtol=5e-2), \
        float(jnp.max(jnp.abs(out2 - ref2)))

    print("KERNEL_OK")
</pallas_src>

<mosaic_0001>
module attributes {stable_mosaic.version = 11 : i64} {
  func.func @_conv_strip_kernel(%arg0: i32, %arg1: i32, %arg2: memref<1x8x18x4xbf16, #tpu.memory_space<vmem>>, %arg3: memref<1x2x18x4xbf16, #tpu.memory_space<vmem>>, %arg4: memref<36x8xbf16, #tpu.memory_space<vmem>>, %arg5: memref<1x8xf32, #tpu.memory_space<vmem>>, %arg6: memref<1x8x16x8xf32, #tpu.memory_space<vmem>>) attributes {dimension_semantics = [#tpu.dimension_semantics<parallel>, #tpu.dimension_semantics<parallel>], iteration_bounds = array<i64: 2, 2>, scalar_prefetch = 0 : i64, scratch_operands = 0 : i64, tpu.core_type = #tpu.core_type<tc>, window_params = [{transform_indices = @transform_0, window_bounds = array<i64: 1, 8, 18, 4>}, {transform_indices = @transform_1, window_bounds = array<i64: 1, 2, 18, 4>}, {pipeline_mode = #tpu.pipeline_mode<synchronous>, transform_indices = @transform_2, window_bounds = array<i64: 36, 8>}, {pipeline_mode = #tpu.pipeline_mode<synchronous>, transform_indices = @transform_3, window_bounds = array<i64: 1, 8>}, {transform_indices = @transform_4, window_bounds = array<i64: 1, 8, 16, 8>}]} {
    %c0 = arith.constant 0 : index
    %c0_0 = arith.constant 0 : index
    %c0_1 = arith.constant 0 : index
    %c0_2 = arith.constant 0 : index
    %0 = vector.load %arg2[%c0, %c0_0, %c0_1, %c0_2] : memref<1x8x18x4xbf16, #tpu.memory_space<vmem>>, vector<1x8x18x4xbf16>
    %1 = vector.shape_cast %0 : vector<1x8x18x4xbf16> to vector<8x18x4xbf16>
    %c0_3 = arith.constant 0 : index
    %c0_4 = arith.constant 0 : index
    %c0_5 = arith.constant 0 : index
    %c0_6 = arith.constant 0 : index
    %2 = vector.load %arg3[%c0_3, %c0_4, %c0_5, %c0_6] : memref<1x2x18x4xbf16, #tpu.memory_space<vmem>>, vector<1x2x18x4xbf16>
    %3 = vector.shape_cast %2 : vector<1x2x18x4xbf16> to vector<2x18x4xbf16>
    %4 = tpu.concatenate %1, %3 in 0 : vector<8x18x4xbf16>, vector<2x18x4xbf16> -> vector<10x18x4xbf16>
    %5 = vector.shape_cast %4 : vector<10x18x4xbf16> to vector<10x1x18x4xbf16>
    %6 = vector.extract_strided_slice %5 {offsets = [0, 0, 0, 0], sizes = [8, 1, 18, 4], strides = [1, 1, 1, 1]} : vector<10x1x18x4xbf16> to vector<8x1x18x4xbf16>
    %7 = vector.shape_cast %6 : vector<8x1x18x4xbf16> to vector<8x18x4xbf16>
    %8 = vector.extract_strided_slice %7 {offsets = [0, 0, 0], sizes = [8, 16, 4], strides = [1, 1, 1]} : vector<8x18x4xbf16> to vector<8x16x4xbf16>
    %9 = vector.extract_strided_slice %7 {offsets = [0, 1, 0], sizes = [8, 16, 4], strides = [1, 1, 1]} : vector<8x18x4xbf16> to vector<8x16x4xbf16>
    %10 = vector.extract_strided_slice %7 {offsets = [0, 2, 0], sizes = [8, 16, 4], strides = [1, 1, 1]} : vector<8x18x4xbf16> to vector<8x16x4xbf16>
    %11 = vector.extract_strided_slice %5 {offsets = [1, 0, 0, 0], sizes = [8, 1, 18, 4], strides = [1, 1, 1, 1]} : vector<10x1x18x4xbf16> to vector<8x1x18x4xbf16>
    %12 = vector.shape_cast %11 : vector<8x1x18x4xbf16> to vector<8x18x4xbf16>
    %13 = vector.extract_strided_slice %12 {offsets = [0, 0, 0], sizes = [8, 16, 4], strides = [1, 1, 1]} : vector<8x18x4xbf16> to vector<8x16x4xbf16>
    %14 = vector.extract_strided_slice %12 {offsets = [0, 1, 0], sizes = [8, 16, 4], strides = [1, 1, 1]} : vector<8x18x4xbf16> to vector<8x16x4xbf16>
    %15 = vector.extract_strided_slice %12 {offsets = [0, 2, 0], sizes = [8, 16, 4], strides = [1, 1, 1]} : vector<8x18x4xbf16> to vector<8x16x4xbf16>
    %16 = vector.extract_strided_slice %5 {offsets = [2, 0, 0, 0], sizes = [8, 1, 18, 4], strides = [1, 1, 1, 1]} : vector<10x1x18x4xbf16> to vector<8x1x18x4xbf16>
    %17 = vector.shape_cast %16 : vector<8x1x18x4xbf16> to vector<8x18x4xbf16>
    %18 = vector.extract_strided_slice %17 {offsets = [0, 0, 0], sizes = [8, 16, 4], strides = [1, 1, 1]} : vector<8x18x4xbf16> to vector<8x16x4xbf16>
    %19 = vector.extract_strided_slice %17 {offsets = [0, 1, 0], sizes = [8, 16, 4], strides = [1, 1, 1]} : vector<8x18x4xbf16> to vector<8x16x4xbf16>
    %20 = vector.extract_strided_slice %17 {offsets = [0, 2, 0], sizes = [8, 16, 4], strides = [1, 1, 1]} : vector<8x18x4xbf16> to vector<8x16x4xbf16>
    %21 = tpu.concatenate %8, %9, %10, %13, %14, %15, %18, %19, %20 in 2 : vector<8x16x4xbf16>, vector<8x16x4xbf16>, vector<8x16x4xbf16>, vector<8x16x4xbf16>, vector<8x16x4xbf16>, vector<8x16x4xbf16>, vector<8x16x4xbf16>, vector<8x16x4xbf16>, vector<8x16x4xbf16> -> vector<8x16x36xbf16>
    %22 = vector.shape_cast %21 : vector<8x16x36xbf16> to vector<128x36xbf16>
    %c0_7 = arith.constant 0 : index
    %c0_8 = arith.constant 0 : index
    %23 = vector.load %arg4[%c0_7, %c0_8] : memref<36x8xbf16, #tpu.memory_space<vmem>>, vector<36x8xbf16>
    %cst = arith.constant dense<0.000000e+00> : vector<128x8xf32>
    %24 = tpu.matmul %22, %23, %cst {dimension_numbers = #tpu.dot_dimension_numbers<[1], [0], [0], [1], [0, 0, 1, 1], [], []>} : vector<128x36xbf16>, vector<36x8xbf16>, vector<128x8xf32> -> vector<128x8xf32>
    %c0_9 = arith.constant 0 : index
    %c0_10 = arith.constant 0 : index
    %25 = vector.load %arg5[%c0_9, %c0_10] : memref<1x8xf32, #tpu.memory_space<vmem>>, vector<1x8xf32>
    %26 = vector.broadcast %25 : vector<1x8xf32> to vector<128x8xf32>
    %27 = arith.addf %24, %26 : vector<128x8xf32>
    %28 = vector.shape_cast %27 : vector<128x8xf32> to vector<8x16x8xf32>
    %cst_11 = arith.constant 0.000000e+00 : f32
    %29 = vector.broadcast %cst_11 : f32 to vector<8x16x8xf32>
    %30 = arith.maximumf %28, %29 : vector<8x16x8xf32>
    %c0_12 = arith.constant 0 : index
    %c0_13 = arith.constant 0 : index
    %c0_14 = arith.constant 0 : index
    %c0_15 = arith.constant 0 : index
    %31 = vector.load %arg6[%c0_12, %c0_13, %c0_14, %c0_15] : memref<1x8x16x8xf32, #tpu.memory_space<vmem>>, vector<1x8x16x8xf32>
    %32 = vector.shape_cast %31 : vector<1x8x16x8xf32> to vector<8x16x8xf32>
    %33 = vector.shape_cast %30 : vector<8x16x8xf32> to vector<1x8x16x8xf32>
    tpu.vector_store %arg6[%c0_12, %c0_13, %c0_14, %c0_15], %33 {strides = array<i32>} : memref<1x8x16x8xf32, #tpu.memory_space<vmem>>, vector<1x8x16x8xf32>,
    return
  }
  func.func @transform_0(%arg0: i32, %arg1: i32) -> (i32, i32, i32, i32) {
    %c0_i32 = arith.constant 0 : i32
    %c0_i32_0 = arith.constant 0 : i32
    %c0_i32_1 = arith.constant 0 : i32
    return %arg0, %arg1, %c0_i32, %c0_i32_0 : i32, i32, i32, i32
  }
  func.func @transform_1(%arg0: i32, %arg1: i32) -> (i32, i32, i32, i32) {
    %c1_i32 = arith.constant 1 : i32
    %0 = arith.addi %arg1, %c1_i32 : i32
    %c4_i32 = arith.constant 4 : i32
    %1 = arith.muli %0, %c4_i32 : i32
    %c0_i32 = arith.constant 0 : i32
    %c0_i32_0 = arith.constant 0 : i32
    %c0_i32_1 = arith.constant 0 : i32
    return %arg0, %1, %c0_i32, %c0_i32_0 : i32, i32, i32, i32
  }
  func.func @transform_2(%arg0: i32, %arg1: i32) -> (i32, i32) {
    %c0_i32 = arith.constant 0 : i32
    %c0_i32_0 = arith.constant 0 : i32
    %c0_i32_1 = arith.constant 0 : i32
    return %c0_i32, %c0_i32_0 : i32, i32
  }
  func.func @transform_3(%arg0: i32, %arg1: i32) -> (i32, i32) {
    %c0_i32 = arith.constant 0 : i32
    %c0_i32_0 = arith.constant 0 : i32
    %c0_i32_1 = arith.constant 0 : i32
    return %c0_i32, %c0_i32_0 : i32, i32
  }
  func.func @transform_4(%arg0: i32, %arg1: i32) -> (i32, i32, i32, i32) {
    %c0_i32 = arith.constant 0 : i32
    %c0_i32_0 = arith.constant 0 : i32
    %c0_i32_1 = arith.constant 0 : i32
    return %arg0, %arg1, %c0_i32, %c0_i32_0 : i32, i32, i32, i32
  }
}

</mosaic_0001>

<bundles_post_ra>
// kernel: tpu_custom_call.1
= control target key start
LH: loop header
LB: loop body
LE: loop exit
PB: predicated region body
PF: predicated region fallthrough
CT: control target
= control target key end

     0   :  { %s1322_s15 = smov 0   ;;  %s1324_s16 = smov 0   ;;  %s1798_s0 = inlined_call_operand.vmem [shape: bf16[2,18,18,4], index: 0, kind: input, shape index: {}]   ;;  %s1799_s1 = inlined_call_operand.vmem [shape: bf16[2,18,18,4], index: 1, kind: input, shape index: {}]   ;;  %s1800_s2 = inlined_call_operand.vmem [shape: bf16[36,8], index: 2, kind: input, shape index: {}]   ;;  %s1801_s3 = inlined_call_operand.vmem [shape: f32[1,8], index: 3, kind: input, shape index: {}]   ;;  %s1802_s4 = inlined_call_operand.vmem [shape: f32[2,16,16,8], index: 4, kind: output, shape index: {}]  }
   0x1   :  { %s1326_s17 = smov 0   ;;  %s1328_s18 = smov 0  }
   0x2   :  { %s1330_s19 = smov 0  }
   0x3 LB: > { %s23_s20 = sadd.s32 1, %s1279_s17  ;;  %s26_s21 = sadd.s32 1, %s1283_s18  ;;  %s1287_s19 = sphi %s1330_s19, %s14_s19   ;;  %s1283_s18 = sphi %s1328_s18, %s1807_s18   ;;  %s1279_s17 = sphi %s1326_s17, %s1806_s17   ;;  %s1275_s16 = sphi %s1324_s16, %s1805_s16   ;;  %s1271_s15 = sphi %s1322_s15, %s1804_s15  }
   0x4   : > { %p24_p0 = scmp.ge.s32.totalorder %s23_s20, 2  ;;  %p1099_p1 = scmp.ge.s32.totalorder %s1287_s19, 1 }
   0x5   : > { %p220_p2 = scmp.lt.s32.totalorder %s1287_s19, 5 }
   0x6   : > { %s1809_s20 = smov (%p24_p0, %s23_s20), 0  ;;  %s1811_s21 = smov (!%p24_p0, %s26_s21), %s1283_s18 }
   0x7   : > { %p221_p3 = pnand %p1099_p1, %p220_p2  ;;  %p28_p4 = scmp.ge.s32.totalorder %s1811_s21, 2 }
   0x8   : > { %s1352_s22 = sshll.u32 (!%p221_p3), %s1271_s15, 3  ;;  %p279_p5 = scmp.lt.s32.totalorder (!%p221_p3), %s1275_s16, 1 }
   0x9   : > { %s1813_s21 = smov (%p28_p4, %s1811_s21), 0  ;;  %224 = sbr.rel (%p221_p3) target bundleno = 455 (0x1c7), region = 36 }
   0xa   : > { %p281_p6 = scmp.lt.s32.totalorder (!%p221_p3), %s1352_s22, 17  ;;  %s1187_s5 = sadd.s32 (!%p221_p3), 8, %s1352_s22 }
   0xb   : > { %s1289_s6 = smov (!%p221_p3), 12   ;;  %p1391_p7 = scmp.lt.s32.totalorder (!%p221_p3), %s1187_s5, 17 }
   0xc   : > { %s1290_s8 = smov (!%p221_p3), 8   ;;  %s1291_s9 = smov (!%p221_p3), 4  }
   0xd   : > { %s1292_s12 = smov (!%p221_p3), 20   ;;  %p312_p8 = scmp.lt.s32.totalorder (!%p221_p3), %s1352_s22, 15 }
   0xe   : > { %s1815_s16 = smov (!%p279_p5, %s1275_s16), 1  ;;  %vm528_vm0 = vcmask 1046528   ;;  %vm415_vm1 = vsmask.f32 7424  ;;  %s1817_s5 = smov (!%p1391_p7, %s1187_s5), 17  ;;  %vm888_vm2 = vcmask 1041408  }
   0xf   : > { %s282_s23 = scalar_select %p281_p6, %s1352_s22, 17  ;;  %vm711_vm3 = vcmask 31744   ;;  %vm728_vm4 = vcmask 64512   ;;  %vm745_vm5 = vcmask 97280   ;;  %vm762_vm6 = vcmask 130048  }
  0x10   : > { %s1198_s24 = smul.u32 54, %s1815_s16  ;;  %vm779_vm7 = vcmask 162816   ;;  %vm796_vm8 = vcmask 195584   ;;  %vm830_vm9 = vcmask 261120   ;;  %vm813_vm10 = vcmask 228352   ;;  %s1819_s22 = smov (!%p312_p8, %s1352_s22), 15 }
  0x11   : > { %s1197_s25 = smul.u32 3, %s282_s23  ;;  %vm871_vm11 = vcmask 293888  }
  0x12   : > { %s1199_s10 = smul.u32 3, %s1817_s5 }
  0x13   : > { %s285_s26 = sadd.s32 %s1198_s24, %s1197_s25  ;;  %s1294_s25 = smov 24  }
  0x14   : > { %s1101_s27 = sshll.u32 %s285_s26, 2  ;;  %s303_s11 = sadd.s32 %s1199_s10, %s1198_s24 }
  0x15   : > { %s1364_s30 = scalar_lea.vmem %s1798_s0, %s1101_s27  ;;  %s1104_s13 = sshll.u32 %s303_s11, 2 }
  0x16   : > { %v1367_v0 = vld [vmem:[%s1364_s30 + $0x30] sm:$0xff]  ;;  %v335_v1 = vld [vmem:[%s1364_s30 + $0x38] sm:$0x1]  ;;  %v1371_v2 = vld [vmem:[%s1364_s30 + $0x48] sm:$0xff]  ;;  %s1452_s23 = scalar_lea.vmem %s1799_s1, %s1104_s13  ;;  %s1293_s24 = smov 16  }
  0x17   : > { %v403_v3 = vunpack.c.l.b16 %v335_v1  ;;  %v341_v4 = vld [vmem:[%s1364_s30 + $0x50] sm:$0x1]  ;;  %v465_v5 = vshrl.u32 %v1367_v0, 16  ;;  %v467_v6 = vshll.u32 %v1367_v0, 16  ;;  %v344_v8 = vld [vmem:[%s1364_s30 + $0x5c] sm:$0x1] }
  0x18   : > { %v405_v7 = vunpack.c.l.b16 %v341_v4  ;;  %v1378_v9 = vld [vmem:[%s1364_s30 + $0x3c] sm:$0xff]  ;;  %v541_v11 = vrot.slane %v1367_v0, 1  ;;  %v491_v12 = vshll.u32 %v1371_v2, 16  ;;  %v1384_v15 = vld [vmem:[%s1364_s30 + $0x54] sm:$0xff]  ;;  %v406_v18 = vunpack.c.l.b16 %v344_v8  ;;  %v338_v19 = vld [vmem:[%s1364_s30 + $0x44] sm:$0x1] }
  0x19   : > { %v411_v10 = vpack.c.b16 %v403_v3, %v403_v3  ;;  %v469_v13 = vrot.slane %v467_v6, 1  ;;  %582 = vrot.lane.b32.xlu2 %v1378_v9, %s1289_s6  ;;  %v489_v21 = vshrl.u32 %v1371_v2, 16  ;;  %v503_v26 = vshll.u32 %v1384_v15, 16  ;;  %v329_v49 = vld [vmem:[%s1364_s30 + $0x20] sm:$0x1]  ;;  %v1441_v54 = vld [vmem:[%s1364_s30 + $0x18] sm:$0xff] }
  0x1a   : > { %v413_v14 = vpack.c.b16 %v405_v7, %v405_v7  ;;  %v493_v24 = vrot.slane %v491_v12, 1  ;;  %v404_v27 = vunpack.c.l.b16 %v338_v19  ;;  %v547_v29 = vrot.slane %v1371_v2, 1  ;;  %v323_v52 = vld [vmem:[%s1364_s30 + $0x8] sm:$0x1]  ;;  %v1447_v57 = vld [vmem:[%s1364_s30] sm:$0xff]  ;;  %s1295_s26 = smov 28  }
  0x1b   : > { %v542_v16 = vrot.slane %v411_v10, 1  ;;  %v472_v17 = vshll.u32 %v411_v10, 16  ;;  %v470_v20 = vor.u32 %v469_v13, %v465_v5  ;;  %v414_v31 = vpack.c.b16 %v406_v18, %v406_v18  ;;  %v1461_v63 = vld [vmem:[%s1452_s23] sm:$0xff]  ;;  %v347_v4 = vld [vmem:[%s1452_s23 + $0x8] sm:$0x1]  ;;  %s1296_s27 = smov 32  }
  0x1c   : > { %v496_v25 = vshll.u32 %v413_v14, 16  ;;  %v548_v30 = vrot.slane %v413_v14, 1  ;;  %v494_v32 = vor.u32 %v493_v24, %v489_v21  ;;  %v412_v34 = vpack.c.b16 %v404_v27, %v404_v27 }
  0x1d   : > { %v1397_v22 = vsel %vm528_vm0, %v541_v11, %v542_v16  ;;  %v474_v23 = vrot.slane %v472_v17, 1  ;;  %v479_v35 = vshll.u32 %v1378_v9, 16  ;;  %v501_v36 = vshrl.u32 %v1384_v15, 16 }
  0x1e   : > { %561 = vrot.lane.b32.xlu1 %v1397_v22, %s1290_s8  ;;  %v498_v33 = vrot.slane %v496_v25, 1  ;;  %v505_v37 = vrot.slane %v503_v26, 1  ;;  %v1417_v38 = vsel %vm528_vm0, %v547_v29, %v548_v30  ;;  %v508_v39 = vshll.u32 %v414_v31, 16  ;;  %v332_v30 = vld [vmem:[%s1364_s30 + $0x2c] sm:$0x1] }
  0x1f   : > { %v1403_v28 = vsel %vm415_vm1, %v470_v20, %v474_v23  ;;  %v544_v40 = vrot.slane %v1378_v9, 1  ;;  %v545_v41 = vrot.slane %v412_v34, 1  ;;  %v477_v43 = vshrl.u32 %v1378_v9, 16 }
  0x20   : > { %520 = vrot.lane.b32.xlu0 %v1403_v28, %s1291_s9  ;;  %v1421_v42 = vsel %vm415_vm1, %v494_v32, %v498_v33  ;;  %v481_v44 = vrot.slane %v479_v35, 1  ;;  %v484_v45 = vshll.u32 %v412_v34, 16  ;;  %v506_v46 = vor.u32 %v505_v37, %v501_v36  ;;  %v326_v33 = vld [vmem:[%s1364_s30 + $0x14] sm:$0x1]  ;;  %v1495_v37 = vld [vmem:[%s1364_s30 + $0x24] sm:$0xff] }
  0x21   : > { %586 = vrot.lane.b32.xlu2 %v1384_v15, %s1289_s6  ;;  %v510_v47 = vrot.slane %v508_v39, 1  ;;  %v1427_v48 = vsel %vm528_vm0, %v544_v40, %v545_v41  ;;  %v401_v55 = vunpack.c.l.b16 %v329_v49  ;;  %v399_v58 = vunpack.c.l.b16 %v323_v52 }
  0x22   : > { %v482_v50 = vor.u32 %v481_v44, %v477_v43  ;;  %v486_v51 = vrot.slane %v484_v45, 1  ;;  %v443_v60 = vshll.u32 %v1441_v54, 16  ;;  %v550_v61 = vrot.slane %v1384_v15, 1  ;;  %v1501_v43 = vld [vmem:[%s1364_s30 + $0xc] sm:$0xff] }
  0x23   : > { %v1438_v53 = vsel %vm415_vm1, %v506_v46, %v510_v47  ;;  %v409_v59 = vpack.c.b16 %v401_v55, %v401_v55  ;;  %v551_v62 = vrot.slane %v414_v31, 1  ;;  %v407_v1 = vpack.c.b16 %v399_v58, %v399_v58 }
  0x24   : > { %v1444_v56 = vsel %vm415_vm1, %v482_v50, %v486_v51  ;;  %v419_v3 = vshll.u32 %v1447_v57, 16  ;;  %v441_v5 = vshrl.u32 %v1441_v54, 16  ;;  %v445_v6 = vrot.slane %v443_v60, 1 }
  0x25   : > { %v448_v7 = vshll.u32 %v409_v59, 16  ;;  %v1469_v8 = vsel %vm528_vm0, %v550_v61, %v551_v62  ;;  %v417_v10 = vshrl.u32 %v1447_v57, 16  ;;  %v424_v12 = vshll.u32 %v407_v1, 16 }
  0x26   : > { %565 = vrot.lane.b32.xlu1 %v1417_v38, %s1290_s8  ;;  %v421_v11 = vrot.slane %v419_v3, 1  ;;  %v591_v13 = vunpack.c.l.b16 %v347_v4  ;;  %v446_v14 = vor.u32 %v445_v6, %v441_v5  ;;  %v596_v20 = vshll.u32 %v1461_v63, 16 }
  0x27   : > { %v450_v16 = vrot.slane %v448_v7, 1  ;;  %v426_v18 = vrot.slane %v424_v12, 1  ;;  %v535_v23 = vrot.slane %v1441_v54, 1  ;;  %v536_v24 = vrot.slane %v409_v59, 1 }
  0x28   : > { %524 = vrot.lane.b32.xlu0 %v1421_v42, %s1291_s9  ;;  %v422_v17 = vor.u32 %v421_v11, %v417_v10  ;;  %v592_v19 = vpack.c.b16 %v591_v13, %v591_v13  ;;  %v594_v26 = vshrl.u32 %v1461_v63, 16  ;;  %v598_v27 = vrot.slane %v596_v20, 1 }
  0x29   : > { %632 = vrot.lane.b32.xlu2 %v1427_v48, %s1292_s12  ;;  %v1480_v21 = vsel %vm415_vm1, %v446_v14, %v450_v16  ;;  %v529_v31 = vrot.slane %v1447_v57, 1  ;;  %v530_v32 = vrot.slane %v407_v1, 1  ;;  %v1491_v34 = vsel %vm528_vm0, %v535_v23, %v536_v24  ;;  %v1183_v23 = vld [vmem:[%s1452_s23 + $0xc] sm:$0xff] }
  0x2a   : > { %v427_v25 = vsel %vm415_vm1, %v422_v17, %v426_v18  ;;  %v601_v29 = vshll.u32 %v592_v19, 16  ;;  %v599_v35 = vor.u32 %v598_v27, %v594_v26  ;;  %v402_v39 = vunpack.c.l.b16 %v332_v30 }
  0x2b   : > { %v400_v40 = vunpack.c.l.b16 %v326_v33  ;;  %v531_v41 = vsel %vm528_vm0, %v529_v31, %v530_v32  ;;  %v455_v44 = vshll.u32 %v1495_v37, 16  ;;  %v621_v47 = vrot.slane %v1461_v63, 1 }
  0x2c   : > { %v603_v36 = vrot.slane %v601_v29, 1  ;;  %v410_v46 = vpack.c.b16 %v402_v39, %v402_v39  ;;  %v622_v49 = vrot.slane %v592_v19, 1  ;;  %v431_v51 = vshll.u32 %v1501_v43, 16  ;;  %v350_v19 = vld [vmem:[%s1452_s23 + $0x14] sm:$0x1] }
  0x2d   : > { %v408_v50 = vpack.c.b16 %v400_v40, %v400_v40  ;;  %v453_v52 = vshrl.u32 %v1495_v37, 16  ;;  %v457_v55 = vrot.slane %v455_v44, 1  ;;  %v429_v60 = vshrl.u32 %v1501_v43, 16 }
  0x2e   : > { %617 = vrot.lane.b32.xlu1 %v1438_v53, %s1293_s24  ;;  %v604_v45 = vsel %vm415_vm1, %v599_v35, %v603_v36  ;;  %v460_v58 = vshll.u32 %v410_v46, 16  ;;  %v623_v59 = vsel %vm528_vm0, %v621_v47, %v622_v49  ;;  %v433_v61 = vrot.slane %v431_v51, 1  ;;  %v1184_v47 = vld [vmem:[%s1800_s2] sm:$0xff] }
  0x2f   : > { %v436_v62 = vshll.u32 %v408_v50, 16  ;;  %v458_v1 = vor.u32 %v457_v55, %v453_v52  ;;  %v538_v10 = vrot.slane %v1495_v37, 1  ;;  %v539_v11 = vrot.slane %v410_v46, 1 }
  0x30   : > { %613 = vrot.lane.b32.xlu0 %v1444_v56, %s1293_s24  ;;  %v462_v3 = vrot.slane %v460_v58, 1  ;;  %v434_v4 = vor.u32 %v433_v61, %v429_v60  ;;  %v532_v12 = vrot.slane %v1501_v43, 1  ;;  %v533_v13 = vrot.slane %v408_v50, 1 }
  0x31   : > { %657 = vrot.lane.b32.xlu2 %v1461_v63, %s1294_s25  ;;  %v438_v5 = vrot.slane %v436_v62, 1  ;;  %v1531_v14 = vsel %vm528_vm0, %v538_v10, %v539_v11  ;;  %v662_v20 = vunpack.c.l.b16 %v350_v19 }
  0x32   : > { %v1516_v6 = vsel %vm415_vm1, %v458_v1, %v462_v3  ;;  %v1534_v16 = vsel %vm528_vm0, %v532_v12, %v533_v13 }
  0x33   : > { %v439_v7 = vsel %vm415_vm1, %v434_v4, %v438_v5  ;;  %v663_v24 = vpack.c.b16 %v662_v20, %v662_v20 }
  0x35   : > { %v672_v29 = vshll.u32 %v663_v24, 16  ;;  %v693_v50 = vrot.slane %v663_v24, 1 }
  0x36   : > { %653 = vrot.lane.b32.xlu1 %v1371_v2, %s1294_s25 }
  0x37   : > { %v674_v30 = vrot.slane %v672_v29, 1 }
  0x38   : > { %636 = vrot.lane.b32.xlu0 %v1469_v8, %s1292_s12 }
  0x39   : > { %684 = vrot.lane.b32.xlu2 %v1421_v42, %s1295_s26 }
  0x3e   : > { %516 = vrot.lane.b32.xlu1 %v1480_v21, %s1291_s9 }
  0x40   : > { %512 = vrot.lane.b32.xlu0 %v427_v25, %s1291_s9  ;;  %v667_v25 = vshll.u32 %v1183_v23, 16 }
  0x41   : > { %557 = vrot.lane.b32.xlu2 %v1491_v34, %s1290_s8 }
  0x42   : > { %v669_v27 = vrot.slane %v667_v25, 1 }
  0x46   : > { %553 = vrot.lane.b32.xlu1 %v531_v41, %s1290_s8 }
  0x48   : > { %688 = vrot.lane.b32.xlu0 %v604_v45, %s1295_s26 }
  0x49   : > { %574 = vrot.lane.b32.xlu2 %v1501_v43, %s1289_s6 }
  0x4e   : > { %707 = vrot.lane.b32.xlu1 %v623_v59, %s1296_s27 }
  0x50   : > { %703 = vrot.lane.b32.xlu0 %v1417_v38, %s1296_s27 }
  0x51   : > { %609 = vrot.lane.b32.xlu2 %v1516_v6, %s1293_s24 }
  0x56   : > { %605 = vrot.lane.b32.xlu1 %v439_v7, %s1293_s24 }
  0x58   : > { %578 = vrot.lane.b32.xlu0 %v1495_v37, %s1289_s6 }
  0x59   : > { %645 = vrot.lane.b32.xlu2 %v1441_v54, %s1294_s25 }
  0x5e   : > { %628 = vrot.lane.b32.xlu1 %v1531_v14, %s1292_s12 }
  0x60   : > { %624 = vrot.lane.b32.xlu0 %v1534_v16, %s1292_s12 }
  0x61   : > { %680 = vrot.lane.b32.xlu2 %v1403_v28, %s1295_s26 }
  0x66   : > { %676 = vrot.lane.b32.xlu1 %v1480_v21, %s1295_s26 }
  0x68   : > { %649 = vrot.lane.b32.xlu0 %v1367_v0, %s1294_s25 }
  0x69   : > { %522 = vrot.lane.b32.xlu2 %v1444_v56, %s1291_s9 }
  0x6e   : > { %699 = vrot.lane.b32.xlu1 %v1397_v22, %s1296_s27 }
  0x70   : > { %695 = vrot.lane.b32.xlu0 %v1491_v34, %s1296_s27 }
  0x71   : > { %567 = vrot.lane.b32.xlu2 %v1469_v8, %s1290_s8 }
  0x73   : > { %v1554_v17 = vpop.permute.xlu2 %582 }
  0x76   : > { %563 = vrot.lane.b32.xlu1 %v1427_v48, %s1290_s8 }
  0x78   : > { %526 = vrot.lane.b32.xlu0 %v1438_v53, %s1291_s9 }
  0x79   : > { %615 = vrot.lane.b32.xlu2 %v1421_v42, %s1293_s24  ;;  %v665_v42 = vshrl.u32 %v1183_v23, 16 }
  0x7b   : > { %v1562_v18 = vpop.permute.xlu2 %586 }
  0x7e   : > { %588 = vrot.lane.b32.xlu1 %v1461_v63, %s1289_s6  ;;  %v670_v63 = vor.u32 %v669_v27, %v665_v42 }
  0x80   : > { %584 = vrot.lane.b32.xlu0 %v1371_v2, %s1289_s6  ;;  %v675_v32 = vsel %vm415_vm1, %v670_v63, %v674_v30 }
  0x81   : > { %638 = vrot.lane.b32.xlu2 %v623_v59, %s1292_s12 }
  0x83   : > { %v1571_v26 = vpop.permute.xlu2 %632 }
  0x86   : > { %634 = vrot.lane.b32.xlu1 %v1417_v38, %s1292_s12  ;;  %v851_v38 = vld [vmem:[%s1800_s2 + $0x10] sm:$0x3] }
  0x87   : > { %v865_v36 = vunpack.c.l.b16 %v851_v38 }
  0x88   : > { %619 = vrot.lane.b32.xlu0 %v604_v45, %s1293_s24  ;;  %v1185_v45 = vld [vmem:[%s1800_s2 + $0x8] sm:$0xff] }
  0x89   : > { %514 = vrot.lane.b32.xlu2 %v439_v7, %s1291_s9  ;;  %v868_v40 = vpack.c.b16 %v865_v36, %v865_v36 }
  0x8b   : > { %v1577_v31 = vpop.permute.xlu2 %657  ;;  %v890_v41 = vsel %vm888_vm2, %v868_v40, 0 }
  0x8c   : > { %1190 = vmatpush.bf16.msra.mxu3 %v890_v41  ;;  %1189 = vmatpush.bf16.msra.mxu2 %v890_v41 }
  0x8d   : > { %1188 = vmatpush.bf16.msra.mxu1 %v890_v41  ;;  %897 = vmatpush.bf16.msra.mxu0 %v890_v41 }
  0x8e   : > { %659 = vrot.lane.b32.xlu1 %v1183_v23, %s1294_s25 }
  0x90   : > { %v562_v33 = vpop.permute.xlu1 %561  ;;  %655 = vrot.lane.b32.xlu0 %v1384_v15, %s1294_s25  ;;  %1193 = vmatpush.bf16.msra.mxu3 %v1185_v45 }
  0x91   : > { %690 = vrot.lane.b32.xlu2 %v675_v32, %s1295_s26  ;;  %1192 = vmatpush.bf16.msra.mxu2 %v1185_v45 }
  0x92   : > { %v521_v35 = vpop.permute.xlu0 %520  ;;  %1191 = vmatpush.bf16.msra.mxu1 %v1185_v45  ;;  %898 = vmatpush.bf16.msra.mxu0 %v1185_v45 }
  0x93   : > { %v1587_v39 = vpop.permute.xlu2 %684  ;;  %v721_v1 = vsel %vm711_vm3, %v1367_v0, %v521_v35 }
  0x94   : > { %1196 = vmatpush.bf16.msra.mxu3 %v1184_v47 }
  0x95   : > { %1195 = vmatpush.bf16.msra.mxu2 %v1184_v47 }
  0x96   : > { %686 = vrot.lane.b32.xlu1 %v1438_v53, %s1295_s26  ;;  %1194 = vmatpush.bf16.msra.mxu1 %v1184_v47 }
  0x97   : > { %899 = vmatpush.bf16.msra.mxu0 %v1184_v47 }
  0x98   : > { %v566_v44 = vpop.permute.xlu1 %565  ;;  %518 = vrot.lane.b32.xlu0 %v1516_v6, %s1291_s9 }
  0x99   : > { %705 = vrot.lane.b32.xlu2 %v1469_v8, %s1296_s27  ;;  %v692_v8 = vrot.slane %v1183_v23, 1 }
  0x9a   : > { %v525_v46 = vpop.permute.xlu0 %524 }
  0x9b   : > { %v1598_v53 = vpop.permute.xlu2 %557  ;;  %v694_v55 = vsel %vm528_vm0, %v692_v8, %v693_v50 }
  0x9e   : > { %559 = vrot.lane.b32.xlu1 %v1531_v14, %s1290_s8 }
  0xa0   : > { %v618_v49 = vpop.permute.xlu1 %617  ;;  %555 = vrot.lane.b32.xlu0 %v1534_v16, %s1290_s8  ;;  %s1107_s8 = sshll.u32 %s1815_s16, 5 }
  0xa1   : > { %580 = vrot.lane.b32.xlu2 %v1367_v0, %s1289_s6 }
  0xa2   : > { %v614_v51 = vpop.permute.xlu0 %613 }
  0xa3   : > { %v1609_v52 = vpop.permute.xlu2 %574 }
  0xa6   : > { %576 = vrot.lane.b32.xlu1 %v1441_v54, %s1289_s6  ;;  %s1106_s6 = sshll.u32 %s1819_s22, 1 }
  0xa7   : > { %s316_s9 = sadd.s32 %s1107_s8, %s1106_s6 }
  0xa8   : > { %v654_v58 = vpop.permute.xlu1 %653  ;;  %709 = vrot.lane.b32.xlu0 %v694_v55, %s1296_s27  ;;  %s1108_s13 = sshll.u32 %s316_s9, 3 }
  0xa9   : > { %626 = vrot.lane.b32.xlu2 %v1491_v34, %s1292_s12  ;;  %v725_v34 = vsel %vm711_vm3, %v1371_v2, %v525_v46  ;;  %s1734_s23 = scalar_lea.vmem %s1802_s4, %s1108_s13 }
  0xaa   : > { %v637_v59 = vpop.permute.xlu0 %636  ;;  %v742_v3 = vsel %vm728_vm4, %v725_v34, %v566_v44 }
  0xab   : > { %v610_v60 = vpop.permute.xlu2 %609  ;;  %v759_v0 = vsel %vm745_vm5, %v742_v3, %v1562_v18 }
  0xac   : > { %v776_v7 = vsel %vm762_vm6, %v759_v0, %v618_v49 }
  0xad   : > { %v793_v11 = vsel %vm779_vm7, %v776_v7, %v637_v59 }
  0xae   : > { %611 = vrot.lane.b32.xlu1 %v1403_v28, %s1293_s24  ;;  %v738_v28 = vsel %vm728_vm4, %v721_v1, %v562_v33  ;;  %v810_v13 = vsel %vm796_vm8, %v793_v11, %v1577_v31 }
  0xaf   : > { %v755_v2 = vsel %vm745_vm5, %v738_v28, %v1554_v17 }
  0xb0   : > { %v517_v61 = vpop.permute.xlu1 %516  ;;  %607 = vrot.lane.b32.xlu0 %v1480_v21, %s1293_s24  ;;  %v772_v10 = vsel %vm762_vm6, %v755_v2, %v614_v51 }
  0xb1   : > { %651 = vrot.lane.b32.xlu2 %v1378_v9, %s1294_s25  ;;  %v717_v42 = vsel %vm711_vm3, %v1441_v54, %v517_v61 }
  0xb2   : > { %v513_v62 = vpop.permute.xlu0 %512  ;;  %v734_v29 = vsel %vm728_vm4, %v717_v42, %v1598_v53 }
  0xb3   : > { %v646_v21 = vpop.permute.xlu2 %645  ;;  %v713_v63 = vsel %vm711_vm3, %v1447_v57, %v513_v62 }
  0xb6   : > { %647 = vrot.lane.b32.xlu1 %v1495_v37, %s1294_s25 }
  0xb8   : > { %v554_v4 = vpop.permute.xlu1 %553  ;;  %630 = vrot.lane.b32.xlu0 %v1397_v22, %s1292_s12  ;;  %v789_v22 = vsel %vm779_vm7, %v772_v10, %v1571_v26 }
  0xb9   : > { %697 = vrot.lane.b32.xlu2 %v1531_v14, %s1296_s27  ;;  %v806_v12 = vsel %vm796_vm8, %v789_v22, %v654_v58  ;;  %v730_v32 = vsel %vm728_vm4, %v713_v63, %v554_v4 }
  0xba   : > { %v689_v5 = vpop.permute.xlu0 %688  ;;  %v747_v38 = vsel %vm745_vm5, %v730_v32, %v1609_v52 }
  0xbb   : > { %v827_v14 = vsel %vm813_vm10, %v810_v13, %v689_v5  ;;  %v681_v18 = vpop.permute.xlu2 %680 }
  0xbe   : > { %682 = vrot.lane.b32.xlu1 %v1444_v56, %s1295_s26  ;;  %v823_v56 = vsel %vm813_vm10, %v806_v12, %v1587_v39 }
  0xc0   : > { %v708_v16 = vpop.permute.xlu1 %707  ;;  %678 = vrot.lane.b32.xlu0 %v1516_v6, %s1295_s26 }
  0xc1   : > { %v844_v17 = vsel %vm830_vm9, %v827_v14, %v708_v16 }
  0xc2   : > { %1163 = vmatmul.msk.bf16.vlgmr.msra.gmra.mxu3 %vm871_vm11, %v844_v17  ;;  %v704_v19 = vpop.permute.xlu0 %703 }
  0xc3   : > { %v840_v20 = vsel %vm830_vm9, %v823_v56, %v704_v19  ;;  %v523_v25 = vpop.permute.xlu2 %522 }
  0xc4   : > { %1161 = vmatmul.msk.bf16.vlgmr.msra.gmra.mxu2 %vm871_vm11, %v840_v20  ;;  %v723_v61 = vsel %vm711_vm3, %v1378_v9, %v523_v25 }
  0xc8   : > { %v606_v23 = vpop.permute.xlu1 %605  ;;  %701 = vrot.lane.b32.xlu0 %v1427_v48, %s1296_s27 }
  0xc9   : > { %v764_v35 = vsel %vm762_vm6, %v747_v38, %v606_v23 }
  0xca   : > { %v579_v24 = vpop.permute.xlu0 %578 }
  0xcb   : > { %v568_v27 = vpop.permute.xlu2 %567  ;;  %v751_v30 = vsel %vm745_vm5, %v734_v29, %v579_v24 }
  0xcc   : > { %v768_v33 = vsel %vm762_vm6, %v751_v30, %v610_v60 }
  0xd0   : > { %v629_v6 = vpop.permute.xlu1 %628 }
  0xd1   : > { %v785_v54 = vsel %vm779_vm7, %v768_v33, %v629_v6 }
  0xd2   : > { %v625_v26 = vpop.permute.xlu0 %624 }
  0xd3   : > { %v781_v39 = vsel %vm779_vm7, %v764_v35, %v625_v26  ;;  %v616_v57 = vpop.permute.xlu2 %615 }
  0xd4   : > { %v798_v44 = vsel %vm796_vm8, %v781_v39, %v646_v21 }
  0xd8   : > { %v677_v31 = vpop.permute.xlu1 %676 }
  0xd9   : > { %v815_v46 = vsel %vm813_vm10, %v798_v44, %v677_v31 }
  0xda   : > { %v650_v48 = vpop.permute.xlu0 %649 }
  0xdb   : > { %v802_v36 = vsel %vm796_vm8, %v785_v54, %v650_v48  ;;  %v639_v8 = vpop.permute.xlu2 %638 }
  0xdc   : > { %v819_v41 = vsel %vm813_vm10, %v802_v36, %v681_v18 }
  0xe0   : > { %v700_v40 = vpop.permute.xlu1 %699 }
  0xe1   : > { %v836_v45 = vsel %vm830_vm9, %v819_v41, %v700_v40 }
  0xe2   : > { %1159 = vmatmul.msk.bf16.vlgmr.msra.gmra.mxu1 %vm871_vm11, %v836_v45  ;;  %v696_v53 = vpop.permute.xlu0 %695 }
  0xe3   : > { %v832_v47 = vsel %vm830_vm9, %v815_v46, %v696_v53  ;;  %v515_v55 = vpop.permute.xlu2 %514  ;;  %v1728_v46 = vld [vmem:[%s1801_s3] ss:$0 sm:$0xff] }
  0xe4   : > { %1157 = vmatmul.msk.bf16.vlgmr.msra.gmra.mxu0 %vm871_vm11, %v832_v47  ;;  %v715_v42 = vsel %vm711_vm3, %v1501_v43, %v515_v55 }
  0xe8   : > { %v564_v49 = vpop.permute.xlu1 %563 }
  0xe9   : > { %v740_v1 = vsel %vm728_vm4, %v723_v61, %v564_v49 }
  0xea   : > { %v527_v50 = vpop.permute.xlu0 %526 }
  0xeb   : > { %v691_v60 = vpop.permute.xlu2 %690  ;;  %v727_v9 = vsel %vm711_vm3, %v1384_v15, %v527_v50 }
  0xec   : > { %v744_v22 = vsel %vm728_vm4, %v727_v9, %v568_v27 }
  0xf0   : > { %v589_v51 = vpop.permute.xlu1 %588 }
  0xf1   : > { %v761_v12 = vsel %vm745_vm5, %v744_v22, %v589_v51 }
  0xf2   : > { %v585_v52 = vpop.permute.xlu0 %584 }
  0xf3   : > { %v757_v28 = vsel %vm745_vm5, %v740_v1, %v585_v52  ;;  %v706_v4 = vpop.permute.xlu2 %705 }
  0xf4   : > { %v774_v3 = vsel %vm762_vm6, %v757_v28, %v616_v57 }
  0xf8   : > { %v635_v58 = vpop.permute.xlu1 %634 }
  0xf9   : > { %v791_v21 = vsel %vm779_vm7, %v774_v3, %v635_v58 }
  0xfa   : > { %v620_v59 = vpop.permute.xlu0 %619 }
  0xfb   : > { %v778_v14 = vsel %vm762_vm6, %v761_v12, %v620_v59  ;;  %v581_v16 = vpop.permute.xlu2 %580 }
  0xfc   : > { %v795_v17 = vsel %vm779_vm7, %v778_v14, %v639_v8 }
 0x100   : > { %v660_v62 = vpop.permute.xlu1 %659 }
 0x101   : > { %v812_v18 = vsel %vm796_vm8, %v795_v17, %v660_v62 }
 0x102   : > { %v656_v34 = vpop.permute.xlu0 %655  ;;  %v829_v19 = vsel %vm813_vm10, %v812_v18, %v691_v60 }
 0x103   : > { %v808_v0 = vsel %vm796_vm8, %v791_v21, %v656_v34  ;;  %v627_v15 = vpop.permute.xlu2 %626 }
 0x108   : > { %v687_v2 = vpop.permute.xlu1 %686 }
 0x109   : > { %v825_v5 = vsel %vm813_vm10, %v808_v0, %v687_v2 }
 0x10a   : > { %v519_v7 = vpop.permute.xlu0 %518  ;;  %v842_v10 = vsel %vm830_vm9, %v825_v5, %v706_v4 }
 0x10b   : > { %1162 = vmatmul.msk.bf16.gmra.mxu2 %vm871_vm11, %v842_v10  ;;  %v652_v6 = vpop.permute.xlu2 %651  ;;  %v719_v31 = vsel %vm711_vm3, %v1495_v37, %v519_v7 }
 0x110   : > { %v560_v11 = vpop.permute.xlu1 %559 }
 0x111   : > { %v736_v32 = vsel %vm728_vm4, %v719_v31, %v560_v11 }
 0x112   : > { %v556_v13 = vpop.permute.xlu0 %555  ;;  %v753_v35 = vsel %vm745_vm5, %v736_v32, %v581_v16 }
 0x113   : > { %v732_v27 = vsel %vm728_vm4, %v715_v42, %v556_v13  ;;  %v698_v33 = vpop.permute.xlu2 %697 }
 0x118   : > { %v577_v56 = vpop.permute.xlu1 %576 }
 0x119   : > { %v749_v29 = vsel %vm745_vm5, %v732_v27, %v577_v56 }
 0x11a   : > { %v710_v20 = vpop.permute.xlu0 %709 }
 0x11b   : > { %v846_v23 = vsel %vm830_vm9, %v829_v19, %v710_v20 }
 0x11c   : > { %1164 = vmatmul.msk.bf16.gmra.mxu3 %vm871_vm11, %v846_v23 }
 0x120   : > { %v612_v25 = vpop.permute.xlu1 %611 }
 0x121   : > { %v770_v39 = vsel %vm762_vm6, %v753_v35, %v612_v25 }
 0x122   : > { %v608_v24 = vpop.permute.xlu0 %607 }
 0x123   : > { %v766_v30 = vsel %vm762_vm6, %v749_v29, %v608_v24 }
 0x124   : > { %v783_v48 = vsel %vm779_vm7, %v766_v30, %v627_v15 }
 0x128   : > { %v648_v63 = vpop.permute.xlu1 %647 }
 0x129   : > { %v800_v38 = vsel %vm796_vm8, %v783_v48, %v648_v63 }
 0x12a   : > { %v631_v26 = vpop.permute.xlu0 %630 }
 0x12b   : > { %v787_v37 = vsel %vm779_vm7, %v770_v39, %v631_v26 }
 0x12c   : > { %v804_v40 = vsel %vm796_vm8, %v787_v37, %v652_v6 }
 0x130   : > { %v683_v57 = vpop.permute.xlu1 %682 }
 0x131   : > { %v821_v41 = vsel %vm813_vm10, %v804_v40, %v683_v57 }
 0x132   : > { %v679_v43 = vpop.permute.xlu0 %678 }
 0x133   : > { %v817_v54 = vsel %vm813_vm10, %v800_v38, %v679_v43 }
 0x134   : > { %v834_v36 = vsel %vm830_vm9, %v817_v54, %v698_v33 }
 0x135   : > { %1158 = vmatmul.msk.bf16.gmra.mxu0 %vm871_vm11, %v834_v36 }
 0x13a   : > { %v702_v44 = vpop.permute.xlu0 %701 }
 0x13b   : > { %v838_v45 = vsel %vm830_vm9, %v821_v41, %v702_v44 }
 0x13c   : > { %1160 = vmatmul.msk.bf16.gmra.mxu1 %vm871_vm11, %v838_v45 }
 0x145   : > { %v931_v53 = vpop.f32.mrf.mxu3 }
 0x146   : > { %v932_v47 = vadd.f32 %v1728_v46, %v931_v53 }
 0x147   : > { %v921_v49 = vpop.f32.mrf.mxu2 }
 0x148   : > { %v953_v8 = vmax.f32 %v932_v47, 0.0  ;;  %v922_v50 = vadd.f32 %v1728_v46, %v921_v49 }
 0x14a   : > { %969 = vst.msk [vmem:[%s1734_s23 + $0x60] sm:$0xff] %vm728_vm4, %v953_v8  ;;  %v949_v51 = vmax.f32 %v922_v50, 0.0 }
 0x14c   : > { %965 = vst.msk [vmem:[%s1734_s23 + $0x40] sm:$0xff] %vm728_vm4, %v949_v51 }
 0x14d   : > { %v933_v52 = vpop.f32.mrf.mxu3 }
 0x14e   : > { %v934_v55 = vadd.f32 %v1728_v46, %v933_v52 }
 0x14f   : > { %v923_v58 = vpop.f32.mrf.mxu2 }
 0x150   : > { %v954_v59 = vmax.f32 %v934_v55, 0.0  ;;  %v924_v60 = vadd.f32 %v1728_v46, %v923_v58 }
 0x152   : > { %970 = vst.msk [vmem:[%s1734_s23 + $0x68] sm:$0xff] %vm728_vm4, %v954_v59  ;;  %v950_v61 = vmax.f32 %v924_v60, 0.0 }
 0x154   : > { %966 = vst.msk [vmem:[%s1734_s23 + $0x48] sm:$0xff] %vm728_vm4, %v950_v61 }
 0x15f   : > { %v911_v62 = vpop.f32.mrf.mxu1 }
 0x160   : > { %v912_v1 = vadd.f32 %v1728_v46, %v911_v62 }
 0x161   : > { %v901_v34 = vpop.f32.mrf.mxu0 }
 0x162   : > { %v945_v28 = vmax.f32 %v912_v1, 0.0  ;;  %v902_v3 = vadd.f32 %v1728_v46, %v901_v34 }
 0x164   : > { %961 = vst.msk [vmem:[%s1734_s23 + $0x20] sm:$0xff] %vm728_vm4, %v945_v28  ;;  %v941_v21 = vmax.f32 %v902_v3, 0.0 }
 0x166   : > { %957 = vst.msk [vmem:[%s1734_s23] sm:$0xff] %vm728_vm4, %v941_v21 }
 0x167   : > { %v913_v4 = vpop.f32.mrf.mxu1 }
 0x168   : > { %v914_v0 = vadd.f32 %v1728_v46, %v913_v4 }
 0x169   : > { %v903_v2 = vpop.f32.mrf.mxu0 }
 0x16a   : > { %v946_v5 = vmax.f32 %v914_v0, 0.0  ;;  %v904_v7 = vadd.f32 %v1728_v46, %v903_v2 }
 0x16c   : > { %962 = vst.msk [vmem:[%s1734_s23 + $0x28] sm:$0xff] %vm728_vm4, %v946_v5  ;;  %v942_v10 = vmax.f32 %v904_v7, 0.0 }
 0x16e   : > { %958 = vst.msk [vmem:[%s1734_s23 + $0x8] sm:$0xff] %vm728_vm4, %v942_v10 }
 0x18e   : > { %v926_v9 = vpop.f32.mrf.mxu2 }
 0x18f   : > { %v927_v11 = vadd.f32 %v1728_v46, %v926_v9 }
 0x191   : > { %v951_v22 = vmax.f32 %v927_v11, 0.0 }
 0x193   : > { %967 = vst.msk [vmem:[%s1734_s23 + $0x50] sm:$0xff] %vm728_vm4, %v951_v22 }
 0x196   : > { %v928_v12 = vpop.f32.mrf.mxu2 }
 0x197   : > { %v929_v13 = vadd.f32 %v1728_v46, %v928_v12 }
 0x199   : > { %v952_v14 = vmax.f32 %v929_v13, 0.0 }
 0x19b   : > { %968 = vst.msk [vmem:[%s1734_s23 + $0x58] sm:$0xff] %vm728_vm4, %v952_v14 }
 0x19f   : > { %v936_v16 = vpop.f32.mrf.mxu3 }
 0x1a0   : > { %v937_v17 = vadd.f32 %v1728_v46, %v936_v16 }
 0x1a2   : > { %v955_v18 = vmax.f32 %v937_v17, 0.0 }
 0x1a4   : > { %971 = vst.msk [vmem:[%s1734_s23 + $0x70] sm:$0xff] %vm728_vm4, %v955_v18 }
 0x1a7   : > { %v938_v56 = vpop.f32.mrf.mxu3 }
 0x1a8   : > { %v939_v19 = vadd.f32 %v1728_v46, %v938_v56 }
 0x1aa   : > { %v956_v20 = vmax.f32 %v939_v19, 0.0 }
 0x1ac   : > { %972 = vst.msk [vmem:[%s1734_s23 + $0x78] sm:$0xff] %vm728_vm4, %v956_v20 }
 0x1b2   : > { %v906_v23 = vpop.f32.mrf.mxu0 }
 0x1b3   : > { %v907_v15 = vadd.f32 %v1728_v46, %v906_v23 }
 0x1b5   : > { %v943_v24 = vmax.f32 %v907_v15, 0.0 }
 0x1b7   : > { %959 = vst.msk [vmem:[%s1734_s23 + $0x10] sm:$0xff] %vm728_vm4, %v943_v24 }
 0x1b9   : > { %v916_v25 = vpop.f32.mrf.mxu1 }
 0x1ba   : > { %v917_v6 = vadd.f32 %v1728_v46, %v916_v25  ;;  %v908_v26 = vpop.f32.mrf.mxu0 }
 0x1bb   : > { %v909_v42 = vadd.f32 %v1728_v46, %v908_v26 }
 0x1bc   : > { %v947_v27 = vmax.f32 %v917_v6, 0.0 }
 0x1bd   : > { %v944_v29 = vmax.f32 %v909_v42, 0.0 }
 0x1be   : > { %963 = vst.msk [vmem:[%s1734_s23 + $0x30] sm:$0xff] %vm728_vm4, %v947_v27 }
 0x1bf   : > { %960 = vst.msk [vmem:[%s1734_s23 + $0x18] sm:$0xff] %vm728_vm4, %v944_v29 }
 0x1c1   : > { %v918_v63 = vpop.f32.mrf.mxu1 }
 0x1c2   : > { %v919_v30 = vadd.f32 %v1728_v46, %v918_v63 }
 0x1c4   : > { %v948_v31 = vmax.f32 %v919_v30, 0.0 }
 0x1c6   : > { %964 = vst.msk [vmem:[%s1734_s23 + $0x38] sm:$0xff] %vm728_vm4, %v948_v31 }
 0x1c7 PF: > { %s14_s19 = sadd.s32 1, %s1287_s19   ;;  %s1804_s15 = smov %s1279_s17 }
 0x1c8   : > { %p11_p9 = scmp.ge.s32.totalorder %s14_s19, 6   ;;  %s1805_s16 = smov %s1283_s18 }
 0x1c9   : > { %s1806_s17 = smov %s1809_s20  ;;  %s1807_s18 = smov %s1813_s21 }
 0x1ca   :  { %13 = sbr.rel (!%p11_p9) target bundleno = 3 (0x3), region = 69 }

</bundles_post_ra>
